<compile_context>
chip_gen: v7x
topology: tpu7x:2x2x1
jax: 0.10.0
libtpu: 0.0.40
codegen_flags: <defaults>
</compile_context>

<pallas_src>
import functools

import jax
import jax.numpy as jnp
from jax.experimental import pallas as pl
from jax.experimental.pallas import tpu as pltpu


_LANE = 128
_SUBLANE = 8
_LANE_TILE_CAP = 4096                   # max lane-tile elements (keeps per-row DMA bounded)
_TARGET_TILE_BYTES = 4 * 1024 * 1024    # ~4 MiB per x/out tile -> ~16 MiB of double buffers
_RESIDENT_PARAM_BYTES = 4 * 1024 * 1024 # keep scale/shift resident below this footprint
_VMEM_LIMIT_BYTES = 48 * 1024 * 1024    # fits v7x (64 MiB phys); raises v5e/v6e scoped default


def _round_up(x, m):
    return ((x + m - 1) // m) * m


def _choose_tiles(nc, hw, itemsize):
    """Pick (tm, tn) so each tile is ~_TARGET_TILE_BYTES and layout-legal."""
    # Lane tile: full spatial extent when modest (block == full dim is always
    # legal), otherwise a 128-multiple chunk so DMAs stay large and lane-dense.
    tn = hw if hw <= _LANE_TILE_CAP else _LANE_TILE_CAP
    # Row tile: as many rows as fit the per-tile budget, multiple of the
    # sublane granularity (16 for 2-byte dtypes, 8 for 4-byte).
    sub = _SUBLANE if itemsize >= 4 else 2 * _SUBLANE
    row_bytes = tn * itemsize
    tm = max(sub, (_TARGET_TILE_BYTES // row_bytes) // sub * sub)
    if nc <= sub:
        tm = nc                          # block == full dim: legal, no masking
    else:
        tm = min(tm, _round_up(nc, sub))
    return tm, tn


def _fbn_kernel(scale_ref, shift_ref, x_ref, o_ref):
    tm = x_ref.shape[0]
    if scale_ref.shape[0] == tm:
        # Per-row-block params (or a single row block): the pipeline already
        # delivered exactly the rows we need.
        scale = scale_ref[...]            # (tm, 1)
        shift = shift_ref[...]
    else:
        # Params are fully VMEM-resident (loaded once); slice this block's rows.
        row0 = pl.program_id(0) * tm
        if tm % _SUBLANE == 0:
            row0 = pl.multiple_of(row0, _SUBLANE)
        scale = scale_ref[pl.ds(row0, tm), :]
        shift = shift_ref[pl.ds(row0, tm), :]
    xv = x_ref[...].astype(jnp.float32)
    o_ref[...] = (xv * scale + shift).astype(o_ref.dtype)


def frozen_batch_norm_2d(x, weight, bias, running_mean, running_var, eps=1e-05,
                         *, tm=None, tn=None):
    """x: (N, C, H, W). Returns x * scale + shift with frozen-BN folded params."""
    N, C, H, W = x.shape
    HW = H * W
    NC = N * C
    itemsize = jnp.dtype(x.dtype).itemsize

    auto_tm, auto_tn = _choose_tiles(NC, HW, itemsize)
    tm = auto_tm if tm is None else tm
    tn = auto_tn if tn is None else tn

    grid_m = pl.cdiv(NC, tm)
    grid_n = pl.cdiv(HW, tn)
    nc_pad = grid_m * tm                 # padded row count so in-kernel pl.ds never OOBs

    # Fold frozen statistics into per-channel scale/shift (cheap JAX glue), then
    # expand to one value per (n, c) row of the flattened slab (row = n*C + c).
    scale = (weight.astype(jnp.float32)
             * jax.lax.rsqrt(running_var.astype(jnp.float32) + eps))          # (C,)
    shift = bias.astype(jnp.float32) - running_mean.astype(jnp.float32) * scale
    scale_rows = jnp.tile(scale, (N,))                                        # (NC,)
    shift_rows = jnp.tile(shift, (N,))
    if nc_pad > NC:
        scale_rows = jnp.pad(scale_rows, ((0, nc_pad - NC),))
        shift_rows = jnp.pad(shift_rows, ((0, nc_pad - NC),))
    scale_rows = scale_rows.reshape(nc_pad, 1)
    shift_rows = shift_rows.reshape(nc_pad, 1)

    # Keep scale/shift fully VMEM-resident (single up-front DMA) unless N*C is
    # huge; the fallback still only re-fetches when the row-block index changes
    # because the spatial axis is the innermost grid axis.
    resident_bytes = nc_pad * _LANE * 4 * 2 * 2   # 2 arrays x 2 buffers, lane-padded rows
    params_resident = resident_bytes <= _RESIDENT_PARAM_BYTES
    if params_resident:
        param_spec = pl.BlockSpec((nc_pad, 1), lambda i, j: (0, 0))
    else:
        param_spec = pl.BlockSpec((tm, 1), lambda i, j: (i, 0))

    x2d = x.reshape(NC, HW)

    out2d = pl.pallas_call(
        _fbn_kernel,
        out_shape=jax.ShapeDtypeStruct((NC, HW), x.dtype),
        grid_spec=pltpu.PrefetchScalarGridSpec(
            num_scalar_prefetch=0,
            grid=(grid_m, grid_n),
            in_specs=[
                param_spec,
                param_spec,
                pl.BlockSpec((tm, tn), lambda i, j: (i, j)),
            ],
            out_specs=pl.BlockSpec((tm, tn), lambda i, j: (i, j)),
        ),
        compiler_params=pltpu.CompilerParams(
            dimension_semantics=("parallel", "parallel"),
            vmem_limit_bytes=_VMEM_LIMIT_BYTES,
        ),
    )(scale_rows, shift_rows, x2d)

    return out2d.reshape(N, C, H, W)


def _reference(x, weight, bias, running_mean, running_var, eps):
    w = weight.reshape(1, -1, 1, 1)
    b = bias.reshape(1, -1, 1, 1)
    rv = running_var.reshape(1, -1, 1, 1)
    rm = running_mean.reshape(1, -1, 1, 1)
    scale = w * jax.lax.rsqrt(rv + eps)
    shift = b - rm * scale
    return x * scale + shift


def _make_inputs(key, N, C, H, W):
    kx, kw, kb, km, kv = jax.random.split(key, 5)
    x = jax.random.normal(kx, (N, C, H, W), dtype=jnp.float32)
    weight = jnp.ones((C,), jnp.float32) + 0.1 * jax.random.normal(kw, (C,), jnp.float32)
    bias = 0.1 * jax.random.normal(kb, (C,), jnp.float32)
    running_mean = 0.1 * jax.random.normal(km, (C,), jnp.float32)
    running_var = jnp.ones((C,), jnp.float32) + 0.05 * jnp.abs(
        jax.random.normal(kv, (C,), jnp.float32))
    return x, weight, bias, running_mean, running_var


if __name__ == "__main__":
    eps = 1e-05

    # Case 1: primary small shape (lane-dense HW=256, single tile).
    x, w, b, rm, rv = _make_inputs(jax.random.PRNGKey(0), 2, 4, 16, 16)
    out = jax.block_until_ready(frozen_batch_norm_2d(x, w, b, rm, rv, eps))
    ref = _reference(x, w, b, rm, rv, eps)
    assert out.shape == x.shape
    assert jnp.allclose(out, ref, atol=1e-5, rtol=1e-5), "case 1 mismatch"

    # Case 2: ragged shape (N*C not a multiple of 8, H*W not a multiple of 128).
    x, w, b, rm, rv = _make_inputs(jax.random.PRNGKey(1), 2, 3, 7, 7)
    out = jax.block_until_ready(frozen_batch_norm_2d(x, w, b, rm, rv, eps))
    ref = _reference(x, w, b, rm, rv, eps)
    assert jnp.allclose(out, ref, atol=1e-5, rtol=1e-5), "case 2 mismatch"

    # Case 3: force a multi-block 2-D grid to exercise the resident-param
    # row slicing and the spatial grid axis.
    x, w, b, rm, rv = _make_inputs(jax.random.PRNGKey(2), 2, 8, 16, 16)
    out = jax.block_until_ready(
        frozen_batch_norm_2d(x, w, b, rm, rv, eps, tm=8, tn=128))
    ref = _reference(x, w, b, rm, rv, eps)
    assert jnp.allclose(out, ref, atol=1e-5, rtol=1e-5), "case 3 mismatch"

    print("KERNEL_OK")
</pallas_src>

<mosaic_0001>
module attributes {stable_mosaic.version = 11 : i64} {
  func.func @_fbn_kernel(%arg0: i32, %arg1: i32, %arg2: memref<8x1xf32, #tpu.memory_space<vmem>>, %arg3: memref<8x1xf32, #tpu.memory_space<vmem>>, %arg4: memref<8x256xf32, #tpu.memory_space<vmem>>, %arg5: memref<8x256xf32, #tpu.memory_space<vmem>>) attributes {dimension_semantics = [#tpu.dimension_semantics<parallel>, #tpu.dimension_semantics<parallel>], iteration_bounds = array<i64: 1, 1>, scalar_prefetch = 0 : i64, scratch_operands = 0 : i64, tpu.core_type = #tpu.core_type<tc>, window_params = [{pipeline_mode = #tpu.pipeline_mode<synchronous>, transform_indices = @transform_0, window_bounds = array<i64: 8, 1>}, {pipeline_mode = #tpu.pipeline_mode<synchronous>, transform_indices = @transform_1, window_bounds = array<i64: 8, 1>}, {transform_indices = @transform_2, window_bounds = array<i64: 8, 256>}, {transform_indices = @transform_3, window_bounds = array<i64: 8, 256>}]} {
    %c0 = arith.constant 0 : index
    %c0_0 = arith.constant 0 : index
    %0 = vector.load %arg2[%c0, %c0_0] : memref<8x1xf32, #tpu.memory_space<vmem>>, vector<8x1xf32>
    %c0_1 = arith.constant 0 : index
    %c0_2 = arith.constant 0 : index
    %1 = vector.load %arg3[%c0_1, %c0_2] : memref<8x1xf32, #tpu.memory_space<vmem>>, vector<8x1xf32>
    %c0_3 = arith.constant 0 : index
    %c0_4 = arith.constant 0 : index
    %2 = vector.load %arg4[%c0_3, %c0_4] : memref<8x256xf32, #tpu.memory_space<vmem>>, vector<8x256xf32>
    %3 = vector.broadcast %0 : vector<8x1xf32> to vector<8x256xf32>
    %4 = arith.mulf %2, %3 : vector<8x256xf32>
    %5 = vector.broadcast %1 : vector<8x1xf32> to vector<8x256xf32>
    %6 = arith.addf %4, %5 : vector<8x256xf32>
    %c0_5 = arith.constant 0 : index
    %c0_6 = arith.constant 0 : index
    %7 = vector.load %arg5[%c0_5, %c0_6] : memref<8x256xf32, #tpu.memory_space<vmem>>, vector<8x256xf32>
    tpu.vector_store %arg5[%c0_5, %c0_6], %6 {strides = array<i32>} : memref<8x256xf32, #tpu.memory_space<vmem>>, vector<8x256xf32>,
    return
  }
  func.func @transform_0(%arg0: i32, %arg1: i32) -> (i32, i32) {
    %c0_i32 = arith.constant 0 : i32
    %c0_i32_0 = arith.constant 0 : i32
    %c0_i32_1 = arith.constant 0 : i32
    return %c0_i32, %c0_i32_0 : i32, i32
  }
  func.func @transform_1(%arg0: i32, %arg1: i32) -> (i32, i32) {
    %c0_i32 = arith.constant 0 : i32
    %c0_i32_0 = arith.constant 0 : i32
    %c0_i32_1 = arith.constant 0 : i32
    return %c0_i32, %c0_i32_0 : i32, i32
  }
  func.func @transform_2(%arg0: i32, %arg1: i32) -> (i32, i32) {
    %c0_i32 = arith.constant 0 : i32
    return %arg0, %arg1 : i32, i32
  }
  func.func @transform_3(%arg0: i32, %arg1: i32) -> (i32, i32) {
    %c0_i32 = arith.constant 0 : i32
    return %arg0, %arg1 : i32, i32
  }
}

</mosaic_0001>

<bundles_post_ra>
// kernel: tpu_custom_call.1
= control target key start
LH: loop header
LB: loop body
LE: loop exit
PB: predicated region body
PF: predicated region fallthrough
CT: control target
= control target key end

     0   :  { %v76_v1 = vmov 0   ;;  %s122_s0 = inlined_call_operand.vmem [shape: f32[8,1], index: 0, kind: input, shape index: {}]   ;;  %s123_s1 = inlined_call_operand.vmem [shape: f32[8,1], index: 1, kind: input, shape index: {}]   ;;  %s124_s2 = inlined_call_operand.vmem [shape: f32[8,256], index: 2, kind: input, shape index: {}]   ;;  %s125_s3 = inlined_call_operand.hbm [shape: f32[8,256], index: 3, kind: output, shape index: {}]  }
   0x1   :  { %v15_v0 = vld [vmem:[%s122_s0] sm:$0xff]  ;;  %51 = vset.pattern.permute.xlu0 %v76_v1 }
   0x2   :  { %8 = vsyncpa [#allocation3], 0  ;;  %21 = vperm.xlu0 %51, %v15_v0   ;;  %v16_v2 = vld [vmem:[%s123_s1] sm:$0xff]  ;;  %v18_v4 = vld [vmem:[%s124_s2 + $0x8] sm:$0xff]  ;;  %s77_s20 = smov [#allocation2]  }
   0x3   :  { %v17_v3 = vld [vmem:[%s124_s2] sm:$0xff]  ;;  %s41_s0 = sshll.u32 %s77_s20, 4  ;;  %s42_s0 = int_to_ptr.vmem [resolvable:$true] %s41_s0 }
   0x4   :  { %s52_s1 = scalar_lea.vmem %s42_s0, 256  ;;  %p57_p1 = scmp.lt.s32.totalorder %s42_s0, %s42_s0 }
   0x5   :  { %p53_p0 = scmp.ne.s32.totalorder %s42_s0, %s52_s1  ;;  %p58_p2 = scmp.lt.s32.totalorder %s52_s1, %s52_s1 }
   0x6   :  { %28 = vperm.xlu0 %51, %v16_v2  }
   0x7   :  { %p59_p3 = por %p58_p2, %p57_p1 }
   0x9   :  { %p60_p4 = pnand %p59_p3, %p53_p0 }
  0x81   :  { %v22_v5 = vpop.permute.xlu0 %21 }
  0x82   :  { %v24_v6 = vmul.f32 %v22_v5, %v17_v3  ;;  %v25_v7 = vmul.f32 %v22_v5, %v18_v4 }
  0x85   :  { %v29_v8 = vpop.permute.xlu0 %28 }
  0x86   :  { %v31_v9 = vadd.f32 %v29_v8, %v24_v6  ;;  %v32_v10 = vadd.f32 %v29_v8, %v25_v7 }
  0x88   :  { %33 = vst [vmem:[#allocation2] sm:$0xff] %v31_v9  ;;  %34 = vst [vmem:[#allocation2 + $0x8] sm:$0xff] %v32_v10 }
  0x89   :  { %63 = shalt.err (!%p60_p4)
}
  0x8a   :  { %s64_s22 = scalar_lea.hbm %s125_s3, 256 }
  0x8b   :  { %p65_p5 = scmp.ne.s32.totalorder %s125_s3, %s64_s22  ;;  %p68_p6 = scmp.lt.u32.totalorder %s64_s22, %s125_s3 }
  0x8d   :  { %p70_p7 = pnand %p68_p6, %p65_p5 }
  0x8f   :  { %73 = shalt.err (!%p70_p7)
}
  0x90   :  { %44 = dma.vmem_to_hbm [thread:$0]  %s42_s0, 256, %s125_s3, [#allocation3]  }
  0x91   :  { %74 = dma.done.wait [#allocation3], 256  }
  0x92   :  { %75 = vsyncadd [#allocation3], 4294967040 }
  0x93   :  { %48 = vsyncpa [#allocation3], 1 }

</bundles_post_ra>
